<compile_context>
chip_gen: v7x
topology: tpu7x:2x2x1
jax: 0.10.0
libtpu: 0.0.40
codegen_flags: <defaults>
</compile_context>

<pallas_src>
import functools
import math

import jax
import jax.numpy as jnp
from jax.experimental import pallas as pl
from jax.experimental.pallas import tpu as pltpu


_HALF_LOG_2PI = 0.5 * math.log(2.0 * math.pi)


def _round_up(x: int, m: int) -> int:
    return ((x + m - 1) // m) * m


def _choose_batch_tile(B: int, block_b: int) -> int:
    """Pick the lane-axis batch tile.

    Multiple of 128 (lane constraint), prefer multiple of 256 (v6e/v7x MXU N width),
    and try to keep at least 2 grid steps so both v7x TensorCores get work.
    """
    block_b = max(128, (int(block_b) // 128) * 128)          # guard non-128-multiple input
    tb = min(block_b, _round_up(pl.cdiv(B, 2), 128))
    if tb % 256 != 0:
        tb256 = min(block_b, _round_up(tb, 256))
        if tb256 % 256 == 0 and (pl.cdiv(B, tb256) >= 2 or pl.cdiv(B, tb) < 2):
            tb = tb256
    return tb


def _vmem_limit_bytes(TB, s_dim, a_dim, h1, h2, in_bytes, out_bytes):
    """Generous scoped-VMEM estimate: double-buffered I/O tiles + f32 intermediates."""
    io = 2 * TB * (s_dim * in_bytes + a_dim * 4 + 3 * a_dim * out_bytes + 4)
    act = 4 * TB * (h1 + h2 + 8 * a_dim + 2)
    est = 2 * (io + act) + (4 << 20)
    return int(min(max(est, 16 << 20), 48 << 20))


def _policy_kernel(state_ref, eps_ref, w1_ref, b1_ref, w2_ref, b2_ref,
                   w3m_ref, b3m_ref, w3s_ref, b3s_ref,
                   act_ref, mean_ref, std_ref, lp_ref,
                   *, log_std_min, log_std_max):
    """Batch-on-lanes forward; inputs arrive in natural (TB, feat) layout."""
    f32 = jnp.float32
    # Contract the feature (last) dim of the natural-layout input against the last dim
    # of the (out_features, in_features) weight -> (out_features, TB): batch on lanes.
    rhs_last = (((1,), (1,)), ((), ()))

    x = state_ref[...].astype(w1_ref.dtype)                      # (TB, s_dim), in-kernel cast
    h = jax.lax.dot_general(w1_ref[...], x, rhs_last, preferred_element_type=f32)
    h = jnp.maximum(h + b1_ref[...], 0.0)                        # (h1, TB) f32
    h = jnp.dot(w2_ref[...], h.astype(w2_ref.dtype), preferred_element_type=f32)
    h = jnp.maximum(h + b2_ref[...], 0.0)                        # (h2, TB) f32
    hc = h.astype(w3m_ref.dtype)

    mean = jnp.dot(w3m_ref[...], hc, preferred_element_type=f32) + b3m_ref[...]
    log_std = jnp.dot(w3s_ref[...], hc, preferred_element_type=f32) + b3s_ref[...]

    # clamp(log_std, log_std_min, log_std_max) against baked-in immediates.
    log_std = jnp.clip(log_std, log_std_min, log_std_max)
    std = jnp.exp(log_std)

    # Flip eps (TB, a_dim) -> (a_dim, TB) with a tiny identity matmul on the MXU
    # (exact, guaranteed lowering; avoids relayout of a 4-lane-wide transpose).
    a_dim = eps_ref.shape[-1]
    rows = jax.lax.broadcasted_iota(jnp.int32, (a_dim, a_dim), 0)
    cols = jax.lax.broadcasted_iota(jnp.int32, (a_dim, a_dim), 1)
    eye = (rows == cols).astype(f32)
    eps = jax.lax.dot_general(eye, eps_ref[...].astype(f32), rhs_last,
                              preferred_element_type=f32)        # (a_dim, TB)

    arctanh_actions = mean + std * eps                           # dist.rsample()

    # Normal(mean, std).log_prob(x).sum(-1): (x - mean)/std is identically eps.
    log_prob = (jnp.sum(-0.5 * eps * eps - log_std, axis=0, keepdims=True)
                - a_dim * _HALF_LOG_2PI)                         # (1, TB)

    action = jnp.tanh(arctanh_actions)
    corr = jnp.sum(jnp.log(1.0 - action * action + 1e-6), axis=0, keepdims=True)
    log_prob = log_prob - corr

    # Four lane-dense stores (no sublane-misaligned concat).
    act_ref[...] = action.astype(act_ref.dtype)
    mean_ref[...] = mean.astype(mean_ref.dtype)
    std_ref[...] = std.astype(std_ref.dtype)
    lp_ref[...] = log_prob.astype(lp_ref.dtype)


def squashed_gaussian_policy_forward(state, params, eps, *,
                                     log_std_min, log_std_max,
                                     block_b=4096,
                                     matmul_dtype=jnp.bfloat16,
                                     out_dtype=jnp.float32,
                                     feature_major_output=True):
    """Forward pass. Returns (action, log_prob, mean, std); (mean, std) is the Normal dist.

    `eps` is the standard-normal noise used for dist.rsample().
    With feature_major_output=True (default, fast path) action/mean/std are (a_dim, B)
    and log_prob is (1, B); with False they are transposed to the PyTorch (B, feat) layout.
    """
    B, s_dim = state.shape
    a_dim = eps.shape[-1]
    h1 = params["w1"].shape[1]
    h2 = params["w2"].shape[1]

    TB = _choose_batch_tile(B, block_b)
    grid = (pl.cdiv(B, TB),)

    # Weights as (out_features, in_features); layer 3 split into mean / log_std heads
    # (weights are tiny and VMEM-resident, so the wrapper-side cast is negligible).
    w1_t = params["w1"].T.astype(matmul_dtype)                   # (h1, s_dim)
    w2_t = params["w2"].T.astype(matmul_dtype)                   # (h2, h1)
    w3 = params["w3"]                                            # (h2, 2*a_dim)
    b3 = params["b3"].reshape(-1)
    w3m_t = w3[:, :a_dim].T.astype(matmul_dtype)                 # (a_dim, h2)
    w3s_t = w3[:, a_dim:].T.astype(matmul_dtype)                 # (a_dim, h2)
    b1_c = params["b1"].reshape(h1, 1).astype(jnp.float32)
    b2_c = params["b2"].reshape(h2, 1).astype(jnp.float32)
    b3m_c = b3[:a_dim].reshape(a_dim, 1).astype(jnp.float32)
    b3s_c = b3[a_dim:].reshape(a_dim, 1).astype(jnp.float32)

    def resident(shape):
        # Full-array block, constant index_map -> stays VMEM-resident across the grid.
        return pl.BlockSpec(shape, lambda i: (0, 0))

    kernel = functools.partial(_policy_kernel,
                               log_std_min=float(log_std_min),
                               log_std_max=float(log_std_max))

    out_shapes = (
        jax.ShapeDtypeStruct((a_dim, B), out_dtype),             # action
        jax.ShapeDtypeStruct((a_dim, B), out_dtype),             # mean
        jax.ShapeDtypeStruct((a_dim, B), out_dtype),             # std
        jax.ShapeDtypeStruct((1, B), jnp.float32),               # log_prob (always f32)
    )
    out_specs = (
        pl.BlockSpec((a_dim, TB), lambda i: (0, i)),
        pl.BlockSpec((a_dim, TB), lambda i: (0, i)),
        pl.BlockSpec((a_dim, TB), lambda i: (0, i)),
        pl.BlockSpec((1, TB), lambda i: (0, i)),
    )

    vmem_limit = _vmem_limit_bytes(
        TB, s_dim, a_dim, h1, h2,
        in_bytes=state.dtype.itemsize,
        out_bytes=jnp.dtype(out_dtype).itemsize)

    action, mean, std, log_prob = pl.pallas_call(
        kernel,
        out_shape=out_shapes,
        grid=grid,
        in_specs=[
            pl.BlockSpec((TB, s_dim), lambda i: (i, 0)),         # state tile (natural layout)
            pl.BlockSpec((TB, a_dim), lambda i: (i, 0)),         # eps tile   (natural layout)
            resident((h1, s_dim)), resident((h1, 1)),            # layer 1
            resident((h2, h1)), resident((h2, 1)),               # layer 2
            resident((a_dim, h2)), resident((a_dim, 1)),         # mean head
            resident((a_dim, h2)), resident((a_dim, 1)),         # log_std head
        ],
        out_specs=out_specs,
        compiler_params=pltpu.CompilerParams(
            dimension_semantics=("parallel",),                   # independent batch tiles
            vmem_limit_bytes=vmem_limit),
    )(state, eps, w1_t, b1_c, w2_t, b2_c, w3m_t, b3m_c, w3s_t, b3s_c)

    if not feature_major_output:
        action, mean, std, log_prob = action.T, mean.T, std.T, log_prob.T
    return action, log_prob, mean, std


def init_params(key, s_dim, a_dim, hidden_layers):
    """Deterministic synthetic initialization of the MLP parameters (row-major Linear)."""
    h1, h2 = hidden_layers
    k1, k2, k3 = jax.random.split(key, 3)
    scale = 0.1
    return {
        "w1": scale * jax.random.normal(k1, (s_dim, h1), jnp.float32),
        "b1": jnp.zeros((1, h1), jnp.float32),
        "w2": scale * jax.random.normal(k2, (h1, h2), jnp.float32),
        "b2": jnp.zeros((1, h2), jnp.float32),
        "w3": scale * jax.random.normal(k3, (h2, 2 * a_dim), jnp.float32),
        "b3": jnp.zeros((1, 2 * a_dim), jnp.float32),
    }


def _reference_forward(state, params, eps, log_std_min, log_std_max):
    """Pure-JAX f32 reference matching the PyTorch semantics (natural (B, feat) layout)."""
    h = jnp.maximum(state @ params["w1"] + params["b1"], 0.0)
    h = jnp.maximum(h @ params["w2"] + params["b2"], 0.0)
    mix = h @ params["w3"] + params["b3"]
    a_dim = eps.shape[-1]
    mean, log_std = mix[:, :a_dim], mix[:, a_dim:]
    log_std = jnp.clip(log_std, log_std_min, log_std_max)
    std = jnp.exp(log_std)
    x = mean + std * eps
    lp = jnp.sum(-0.5 * ((x - mean) / std) ** 2 - log_std - _HALF_LOG_2PI,
                 axis=-1, keepdims=True)
    action = jnp.tanh(x)
    corr = jnp.sum(jnp.log(1.0 - action ** 2 + 1e-6), axis=-1, keepdims=True)
    return action, lp - corr, mean, std


if __name__ == "__main__":
    B = 256        # batch: 2 grid steps at TB=128 -> exercises pipelining + 2-TC sharding
    S_DIM = 16     # state dim
    A_DIM = 4      # action dim
    HIDDEN = [32, 32]
    LOG_STD_MIN, LOG_STD_MAX = -20.0, 2.0

    key = jax.random.PRNGKey(0)
    k_params, k_state, k_eps = jax.random.split(key, 3)

    params = init_params(k_params, S_DIM, A_DIM, HIDDEN)
    state = jax.random.normal(k_state, (B, S_DIM), jnp.float32)
    eps = jax.random.normal(k_eps, (B, A_DIM), jnp.float32)     # rsample noise

    ref_action, ref_logp, ref_mean, ref_std = _reference_forward(
        state, params, eps, LOG_STD_MIN, LOG_STD_MAX)

    # --- f32 matmuls, feature-major outputs: tight correctness check ---
    a32, lp32, m32, s32 = squashed_gaussian_policy_forward(
        state, params, eps, log_std_min=LOG_STD_MIN, log_std_max=LOG_STD_MAX,
        matmul_dtype=jnp.float32, out_dtype=jnp.float32)
    jax.block_until_ready((a32, lp32, m32, s32))
    assert a32.shape == (A_DIM, B) and lp32.shape == (1, B)
    assert jnp.allclose(a32, ref_action.T, atol=1e-5), "action mismatch (f32)"
    assert jnp.allclose(lp32, ref_logp.T, atol=1e-4), "log_prob mismatch (f32)"
    assert jnp.allclose(m32, ref_mean.T, atol=1e-5), "mean mismatch (f32)"
    assert jnp.allclose(s32, ref_std.T, atol=1e-5), "std mismatch (f32)"

    # --- natural (B, feat) layout path (matches the PyTorch output layout) ---
    an, lpn, mn, sn = squashed_gaussian_policy_forward(
        state, params, eps, log_std_min=LOG_STD_MIN, log_std_max=LOG_STD_MAX,
        matmul_dtype=jnp.float32, feature_major_output=False)
    jax.block_until_ready((an, lpn, mn, sn))
    assert an.shape == (B, A_DIM) and lpn.shape == (B, 1)
    assert jnp.allclose(an, ref_action, atol=1e-5), "action mismatch (natural layout)"
    assert jnp.allclose(lpn, ref_logp, atol=1e-4), "log_prob mismatch (natural layout)"

    # --- bf16 MXU fast path + bf16 action/mean/std outputs (log_prob stays f32) ---
    a16, lp16, m16, s16 = squashed_gaussian_policy_forward(
        state, params, eps, log_std_min=LOG_STD_MIN, log_std_max=LOG_STD_MAX,
        matmul_dtype=jnp.bfloat16, out_dtype=jnp.bfloat16)
    jax.block_until_ready((a16, lp16, m16, s16))
    assert jnp.allclose(a16.astype(jnp.float32), ref_action.T, atol=5e-2), "action mismatch (bf16)"
    assert jnp.allclose(lp16, ref_logp.T, atol=5e-2), "log_prob mismatch (bf16)"
    assert jnp.allclose(m16.astype(jnp.float32), ref_mean.T, atol=5e-2), "mean mismatch (bf16)"
    assert jnp.allclose(s16.astype(jnp.float32), ref_std.T, atol=5e-2), "std mismatch (bf16)"

    print("KERNEL_OK")
</pallas_src>

<mosaic_0001>
module attributes {stable_mosaic.version = 11 : i64} {
  func.func @_policy_kernel(%arg0: i32, %arg1: memref<128x16xf32, #tpu.memory_space<vmem>>, %arg2: memref<128x4xf32, #tpu.memory_space<vmem>>, %arg3: memref<32x16xf32, #tpu.memory_space<vmem>>, %arg4: memref<32x1xf32, #tpu.memory_space<vmem>>, %arg5: memref<32x32xf32, #tpu.memory_space<vmem>>, %arg6: memref<32x1xf32, #tpu.memory_space<vmem>>, %arg7: memref<4x32xf32, #tpu.memory_space<vmem>>, %arg8: memref<4x1xf32, #tpu.memory_space<vmem>>, %arg9: memref<4x32xf32, #tpu.memory_space<vmem>>, %arg10: memref<4x1xf32, #tpu.memory_space<vmem>>, %arg11: memref<4x128xf32, #tpu.memory_space<vmem>>, %arg12: memref<4x128xf32, #tpu.memory_space<vmem>>, %arg13: memref<4x128xf32, #tpu.memory_space<vmem>>, %arg14: memref<1x128xf32, #tpu.memory_space<vmem>>) attributes {dimension_semantics = [#tpu.dimension_semantics<parallel>], iteration_bounds = array<i64: 2>, scalar_prefetch = 0 : i64, scratch_operands = 0 : i64, tpu.core_type = #tpu.core_type<tc>, window_params = [{transform_indices = @transform_0, window_bounds = array<i64: 128, 16>}, {transform_indices = @transform_1, window_bounds = array<i64: 128, 4>}, {pipeline_mode = #tpu.pipeline_mode<synchronous>, transform_indices = @transform_2, window_bounds = array<i64: 32, 16>}, {pipeline_mode = #tpu.pipeline_mode<synchronous>, transform_indices = @transform_3, window_bounds = array<i64: 32, 1>}, {pipeline_mode = #tpu.pipeline_mode<synchronous>, transform_indices = @transform_4, window_bounds = array<i64: 32, 32>}, {pipeline_mode = #tpu.pipeline_mode<synchronous>, transform_indices = @transform_5, window_bounds = array<i64: 32, 1>}, {pipeline_mode = #tpu.pipeline_mode<synchronous>, transform_indices = @transform_6, window_bounds = array<i64: 4, 32>}, {pipeline_mode = #tpu.pipeline_mode<synchronous>, transform_indices = @transform_7, window_bounds = array<i64: 4, 1>}, {pipeline_mode = #tpu.pipeline_mode<synchronous>, transform_indices = @transform_8, window_bounds = array<i64: 4, 32>}, {pipeline_mode = #tpu.pipeline_mode<synchronous>, transform_indices = @transform_9, window_bounds = array<i64: 4, 1>}, {transform_indices = @transform_10, window_bounds = array<i64: 4, 128>}, {transform_indices = @transform_11, window_bounds = array<i64: 4, 128>}, {transform_indices = @transform_12, window_bounds = array<i64: 4, 128>}, {transform_indices = @transform_13, window_bounds = array<i64: 1, 128>}]} {
    %c0 = arith.constant 0 : index
    %c0_0 = arith.constant 0 : index
    %0 = vector.load %arg1[%c0, %c0_0] : memref<128x16xf32, #tpu.memory_space<vmem>>, vector<128x16xf32>
    %c0_1 = arith.constant 0 : index
    %c0_2 = arith.constant 0 : index
    %1 = vector.load %arg3[%c0_1, %c0_2] : memref<32x16xf32, #tpu.memory_space<vmem>>, vector<32x16xf32>
    %cst = arith.constant dense<0.000000e+00> : vector<32x128xf32>
    %2 = tpu.matmul %1, %0, %cst {dimension_numbers = #tpu.dot_dimension_numbers<[1], [1], [0], [0], [0, 0, 1, 0], [], []>} : vector<32x16xf32>, vector<128x16xf32>, vector<32x128xf32> -> vector<32x128xf32>
    %c0_3 = arith.constant 0 : index
    %c0_4 = arith.constant 0 : index
    %3 = vector.load %arg4[%c0_3, %c0_4] : memref<32x1xf32, #tpu.memory_space<vmem>>, vector<32x1xf32>
    %4 = vector.broadcast %3 : vector<32x1xf32> to vector<32x128xf32>
    %5 = arith.addf %2, %4 : vector<32x128xf32>
    %cst_5 = arith.constant 0.000000e+00 : f32
    %6 = vector.broadcast %cst_5 : f32 to vector<32x128xf32>
    %7 = arith.maximumf %5, %6 : vector<32x128xf32>
    %c0_6 = arith.constant 0 : index
    %c0_7 = arith.constant 0 : index
    %8 = vector.load %arg5[%c0_6, %c0_7] : memref<32x32xf32, #tpu.memory_space<vmem>>, vector<32x32xf32>
    %cst_8 = arith.constant dense<0.000000e+00> : vector<32x128xf32>
    %9 = tpu.matmul %8, %7, %cst_8 {dimension_numbers = #tpu.dot_dimension_numbers<[1], [0], [0], [1], [0, 0, 1, 1], [], []>} : vector<32x32xf32>, vector<32x128xf32>, vector<32x128xf32> -> vector<32x128xf32>
    %c0_9 = arith.constant 0 : index
    %c0_10 = arith.constant 0 : index
    %10 = vector.load %arg6[%c0_9, %c0_10] : memref<32x1xf32, #tpu.memory_space<vmem>>, vector<32x1xf32>
    %11 = vector.broadcast %10 : vector<32x1xf32> to vector<32x128xf32>
    %12 = arith.addf %9, %11 : vector<32x128xf32>
    %cst_11 = arith.constant 0.000000e+00 : f32
    %13 = vector.broadcast %cst_11 : f32 to vector<32x128xf32>
    %14 = arith.maximumf %12, %13 : vector<32x128xf32>
    %c0_12 = arith.constant 0 : index
    %c0_13 = arith.constant 0 : index
    %15 = vector.load %arg7[%c0_12, %c0_13] : memref<4x32xf32, #tpu.memory_space<vmem>>, vector<4x32xf32>
    %cst_14 = arith.constant dense<0.000000e+00> : vector<4x128xf32>
    %16 = tpu.matmul %15, %14, %cst_14 {dimension_numbers = #tpu.dot_dimension_numbers<[1], [0], [0], [1], [0, 0, 1, 1], [], []>} : vector<4x32xf32>, vector<32x128xf32>, vector<4x128xf32> -> vector<4x128xf32>
    %c0_15 = arith.constant 0 : index
    %c0_16 = arith.constant 0 : index
    %17 = vector.load %arg8[%c0_15, %c0_16] : memref<4x1xf32, #tpu.memory_space<vmem>>, vector<4x1xf32>
    %18 = vector.broadcast %17 : vector<4x1xf32> to vector<4x128xf32>
    %19 = arith.addf %16, %18 : vector<4x128xf32>
    %c0_17 = arith.constant 0 : index
    %c0_18 = arith.constant 0 : index
    %20 = vector.load %arg9[%c0_17, %c0_18] : memref<4x32xf32, #tpu.memory_space<vmem>>, vector<4x32xf32>
    %cst_19 = arith.constant dense<0.000000e+00> : vector<4x128xf32>
    %21 = tpu.matmul %20, %14, %cst_19 {dimension_numbers = #tpu.dot_dimension_numbers<[1], [0], [0], [1], [0, 0, 1, 1], [], []>} : vector<4x32xf32>, vector<32x128xf32>, vector<4x128xf32> -> vector<4x128xf32>
    %c0_20 = arith.constant 0 : index
    %c0_21 = arith.constant 0 : index
    %22 = vector.load %arg10[%c0_20, %c0_21] : memref<4x1xf32, #tpu.memory_space<vmem>>, vector<4x1xf32>
    %23 = vector.broadcast %22 : vector<4x1xf32> to vector<4x128xf32>
    %24 = arith.addf %21, %23 : vector<4x128xf32>
    %cst_22 = arith.constant -2.000000e+01 : f32
    %cst_23 = arith.constant 2.000000e+00 : f32
    %25 = vector.broadcast %cst_22 : f32 to vector<4x128xf32>
    %26 = arith.maximumf %25, %24 : vector<4x128xf32>
    %27 = vector.broadcast %cst_23 : f32 to vector<4x128xf32>
    %28 = arith.minimumf %27, %26 : vector<4x128xf32>
    %29 = math.exp %28 : vector<4x128xf32>
    %30 = tpu.iota {dimensions = array<i32: 0>} : vector<4x4xi32>
    %31 = tpu.iota {dimensions = array<i32: 1>} : vector<4x4xi32>
    %32 = arith.cmpi eq, %30, %31 : vector<4x4xi32>
    %33 = arith.extui %32 : vector<4x4xi1> to vector<4x4xi32>
    %34 = arith.sitofp %33 : vector<4x4xi32> to vector<4x4xf32>
    %c0_24 = arith.constant 0 : index
    %c0_25 = arith.constant 0 : index
    %35 = vector.load %arg2[%c0_24, %c0_25] : memref<128x4xf32, #tpu.memory_space<vmem>>, vector<128x4xf32>
    %cst_26 = arith.constant dense<0.000000e+00> : vector<4x128xf32>
    %36 = tpu.matmul %34, %35, %cst_26 {dimension_numbers = #tpu.dot_dimension_numbers<[1], [1], [0], [0], [0, 0, 1, 0], [], []>} : vector<4x4xf32>, vector<128x4xf32>, vector<4x128xf32> -> vector<4x128xf32>
    %37 = arith.mulf %29, %36 : vector<4x128xf32>
    %38 = arith.addf %19, %37 : vector<4x128xf32>
    %cst_27 = arith.constant -5.000000e-01 : f32
    %39 = vector.broadcast %cst_27 : f32 to vector<4x128xf32>
    %40 = arith.mulf %39, %36 : vector<4x128xf32>
    %41 = arith.mulf %40, %36 : vector<4x128xf32>
    %42 = arith.subf %41, %28 : vector<4x128xf32>
    %cst_28 = arith.constant dense<0.000000e+00> : vector<128xf32>
    %43 = vector.multi_reduction <add>, %42, %cst_28 [0] : vector<4x128xf32> to vector<128xf32>
    %44 = vector.shape_cast %43 : vector<128xf32> to vector<1x128xf32>
    %cst_29 = arith.constant 3.67575407 : f32
    %45 = vector.broadcast %cst_29 : f32 to vector<1x128xf32>
    %46 = arith.subf %44, %45 : vector<1x128xf32>
    %47 = math.tanh %38 : vector<4x128xf32>
    %48 = arith.mulf %47, %47 : vector<4x128xf32>
    %cst_30 = arith.constant 1.000000e+00 : f32
    %49 = vector.broadcast %cst_30 : f32 to vector<4x128xf32>
    %50 = arith.subf %49, %48 : vector<4x128xf32>
    %cst_31 = arith.constant 9.99999997E-7 : f32
    %51 = vector.broadcast %cst_31 : f32 to vector<4x128xf32>
    %52 = arith.addf %50, %51 : vector<4x128xf32>
    %53 = math.log %52 : vector<4x128xf32>
    %cst_32 = arith.constant dense<0.000000e+00> : vector<128xf32>
    %54 = vector.multi_reduction <add>, %53, %cst_32 [0] : vector<4x128xf32> to vector<128xf32>
    %55 = vector.shape_cast %54 : vector<128xf32> to vector<1x128xf32>
    %56 = arith.subf %46, %55 : vector<1x128xf32>
    %c0_33 = arith.constant 0 : index
    %c0_34 = arith.constant 0 : index
    %57 = vector.load %arg11[%c0_33, %c0_34] : memref<4x128xf32, #tpu.memory_space<vmem>>, vector<4x128xf32>
    tpu.vector_store %arg11[%c0_33, %c0_34], %47 {strides = array<i32>} : memref<4x128xf32, #tpu.memory_space<vmem>>, vector<4x128xf32>,
    %c0_35 = arith.constant 0 : index
    %c0_36 = arith.constant 0 : index
    %58 = vector.load %arg12[%c0_35, %c0_36] : memref<4x128xf32, #tpu.memory_space<vmem>>, vector<4x128xf32>
    tpu.vector_store %arg12[%c0_35, %c0_36], %19 {strides = array<i32>} : memref<4x128xf32, #tpu.memory_space<vmem>>, vector<4x128xf32>,
    %c0_37 = arith.constant 0 : index
    %c0_38 = arith.constant 0 : index
    %59 = vector.load %arg13[%c0_37, %c0_38] : memref<4x128xf32, #tpu.memory_space<vmem>>, vector<4x128xf32>
    tpu.vector_store %arg13[%c0_37, %c0_38], %29 {strides = array<i32>} : memref<4x128xf32, #tpu.memory_space<vmem>>, vector<4x128xf32>,
    %c0_39 = arith.constant 0 : index
    %c0_40 = arith.constant 0 : index
    %60 = vector.load %arg14[%c0_39, %c0_40] : memref<1x128xf32, #tpu.memory_space<vmem>>, vector<1x128xf32>
    tpu.vector_store %arg14[%c0_39, %c0_40], %56 {strides = array<i32>} : memref<1x128xf32, #tpu.memory_space<vmem>>, vector<1x128xf32>,
    return
  }
  func.func @transform_0(%arg0: i32) -> (i32, i32) {
    %c0_i32 = arith.constant 0 : i32
    %c0_i32_0 = arith.constant 0 : i32
    return %arg0, %c0_i32 : i32, i32
  }
  func.func @transform_1(%arg0: i32) -> (i32, i32) {
    %c0_i32 = arith.constant 0 : i32
    %c0_i32_0 = arith.constant 0 : i32
    return %arg0, %c0_i32 : i32, i32
  }
  func.func @transform_2(%arg0: i32) -> (i32, i32) {
    %c0_i32 = arith.constant 0 : i32
    %c0_i32_0 = arith.constant 0 : i32
    %c0_i32_1 = arith.constant 0 : i32
    return %c0_i32, %c0_i32_0 : i32, i32
  }
  func.func @transform_3(%arg0: i32) -> (i32, i32) {
    %c0_i32 = arith.constant 0 : i32
    %c0_i32_0 = arith.constant 0 : i32
    %c0_i32_1 = arith.constant 0 : i32
    return %c0_i32, %c0_i32_0 : i32, i32
  }
  func.func @transform_4(%arg0: i32) -> (i32, i32) {
    %c0_i32 = arith.constant 0 : i32
    %c0_i32_0 = arith.constant 0 : i32
    %c0_i32_1 = arith.constant 0 : i32
    return %c0_i32, %c0_i32_0 : i32, i32
  }
  func.func @transform_5(%arg0: i32) -> (i32, i32) {
    %c0_i32 = arith.constant 0 : i32
    %c0_i32_0 = arith.constant 0 : i32
    %c0_i32_1 = arith.constant 0 : i32
    return %c0_i32, %c0_i32_0 : i32, i32
  }
  func.func @transform_6(%arg0: i32) -> (i32, i32) {
    %c0_i32 = arith.constant 0 : i32
    %c0_i32_0 = arith.constant 0 : i32
    %c0_i32_1 = arith.constant 0 : i32
    return %c0_i32, %c0_i32_0 : i32, i32
  }
  func.func @transform_7(%arg0: i32) -> (i32, i32) {
    %c0_i32 = arith.constant 0 : i32
    %c0_i32_0 = arith.constant 0 : i32
    %c0_i32_1 = arith.constant 0 : i32
    return %c0_i32, %c0_i32_0 : i32, i32
  }
  func.func @transform_8(%arg0: i32) -> (i32, i32) {
    %c0_i32 = arith.constant 0 : i32
    %c0_i32_0 = arith.constant 0 : i32
    %c0_i32_1 = arith.constant 0 : i32
    return %c0_i32, %c0_i32_0 : i32, i32
  }
  func.func @transform_9(%arg0: i32) -> (i32, i32) {
    %c0_i32 = arith.constant 0 : i32
    %c0_i32_0 = arith.constant 0 : i32
    %c0_i32_1 = arith.constant 0 : i32
    return %c0_i32, %c0_i32_0 : i32, i32
  }
  func.func @transform_10(%arg0: i32) -> (i32, i32) {
    %c0_i32 = arith.constant 0 : i32
    %c0_i32_0 = arith.constant 0 : i32
    return %c0_i32, %arg0 : i32, i32
  }
  func.func @transform_11(%arg0: i32) -> (i32, i32) {
    %c0_i32 = arith.constant 0 : i32
    %c0_i32_0 = arith.constant 0 : i32
    return %c0_i32, %arg0 : i32, i32
  }
  func.func @transform_12(%arg0: i32) -> (i32, i32) {
    %c0_i32 = arith.constant 0 : i32
    %c0_i32_0 = arith.constant 0 : i32
    return %c0_i32, %arg0 : i32, i32
  }
  func.func @transform_13(%arg0: i32) -> (i32, i32) {
    %c0_i32 = arith.constant 0 : i32
    %c0_i32_0 = arith.constant 0 : i32
    return %c0_i32, %arg0 : i32, i32
  }
}

</mosaic_0001>

<bundles_post_ra>
// kernel: tpu_custom_call.1
= control target key start
LH: loop header
LB: loop body
LE: loop exit
PB: predicated region body
PF: predicated region fallthrough
CT: control target
= control target key end

     0   :  { %s2430_s0 = inlined_call_operand.vmem [shape: f32[256,16], index: 0, kind: input, shape index: {}]   ;;  %s2431_s1 = inlined_call_operand.vmem [shape: f32[256,4], index: 1, kind: input, shape index: {}]   ;;  %s2432_s2 = inlined_call_operand.vmem [shape: f32[32,16], index: 2, kind: input, shape index: {}]   ;;  %s2433_s3 = inlined_call_operand.vmem [shape: f32[32,1], index: 3, kind: input, shape index: {}]   ;;  %s2434_s4 = inlined_call_operand.vmem [shape: f32[32,32], index: 4, kind: input, shape index: {}]   ;;  %s2435_s5 = inlined_call_operand.vmem [shape: f32[32,1], index: 5, kind: input, shape index: {}]   ;;  %s2436_s6 = inlined_call_operand.vmem [shape: f32[4,32], index: 6, kind: input, shape index: {}]   ;;  %s2437_s7 = inlined_call_operand.vmem [shape: f32[4,1], index: 7, kind: input, shape index: {}]   ;;  %s2438_s8 = inlined_call_operand.vmem [shape: f32[4,32], index: 8, kind: input, shape index: {}]   ;;  %s2439_s9 = inlined_call_operand.vmem [shape: f32[4,1], index: 9, kind: input, shape index: {}]   ;;  %s2440_s10 = inlined_call_operand.hbm [shape: f32[4,256], index: 10, kind: output, shape index: {0}]   ;;  %s2441_s11 = inlined_call_operand.hbm [shape: f32[4,256], index: 11, kind: output, shape index: {1}]   ;;  %s2442_s12 = inlined_call_operand.hbm [shape: f32[4,256], index: 12, kind: output, shape index: {2}]   ;;  %s2443_s13 = inlined_call_operand.hbm [shape: f32[1,256], index: 13, kind: output, shape index: {3}]  }
   0x1   :  { %2448 = sst [smem:[#allocation15_spill]] %s2430_s0 }
   0x2   :  { %2449 = sst [smem:[#allocation16_spill]] %s2431_s1 }
   0x3   :  { %2450 = sst [smem:[#allocation17_spill]] %s2432_s2 }
   0x4   :  { %19 = vsyncpa [#allocation3], 0 }
   0x5   :  { %21 = vsyncpa [#allocation3 + $0x1], 0 }
   0x6   :  { %22 = vsyncpa [#allocation5], 0 }
   0x7   :  { %24 = vsyncpa [#allocation5 + $0x1], 0 }
   0x8   :  { %25 = vsyncpa [#allocation8], 0 }
   0x9   :  { %27 = vsyncpa [#allocation8 + $0x1], 0  ;;  %s2011_s25 = smov 0   ;;  %s2013_s26 = smov 0  }
   0xa   :  { %s2015_s27 = smov 0   ;;  %s2017_s28 = smov 0  }
   0xb LB: > { %2451 = sst [smem:[#allocation12_spill]] %s1927_s27  ;;  %s2032_s29 = sadd.s32 4294967295, %s1931_s28   ;;  %s1931_s28 = sphi %s2017_s28, %s2464_s28   ;;  %s1927_s27 = sphi %s2015_s27, %s2466_s27   ;;  %s1923_s26 = sphi %s2013_s26, %s2468_s26   ;;  %s1919_s25 = sphi %s2011_s25, %s2467_s25  }
   0xc   : > { %s2444_s30 = sadd.s32 4294967294, %s1931_s28   ;;  %s2036_s14 = sadd.s32 1, %s1931_s28  }
   0xd   : > { %2452 = sst [smem:[#allocation13_spill]] %s2036_s14  ;;  %s260_s15 = sadd.s32 1, %s1927_s27 }
   0xe   : > { %s257_s16 = ssub.s32 %s1931_s28, %s2036_s14  ;;  %p270_p0 = scmp.ne.s32.totalorder %s1927_s27, %s1923_s26 }
   0xf   : > { %p258_p1 = scmp.eq.s32.totalorder %s257_s16, 0  ;;  %p271_p2 = scmp.eq.s32.totalorder %s2032_s29, 1 }
  0x10   : > { %p276_p3 = scmp.ne.s32.totalorder %s1923_s26, %s1919_s25  ;;  %p277_p4 = scmp.eq.s32.totalorder %s2444_s30, 1 }
  0x11   : > { %s2049_s17 = scalar_select %p258_p1, %s1927_s27, %s260_s15  }
  0x12   : > { %p2051_p5 = por %p271_p2, %p270_p0  ;;  %p2055_p6 = por %p277_p4, %p276_p3 }
  0x13   : > { %2453 = sst [smem:[#allocation14_spill]] %s2049_s17  ;;  %p1385_p7 = scmp.ge.s32.totalorder %s1931_s28, 1 }
  0x14   : > { %p415_p8 = scmp.lt.s32.totalorder %s1931_s28, 3 }
  0x16   : > { %p416_p9 = pnand %p1385_p7, %p415_p8 }
  0x17   : > { %s2062_s20 = sshll.u32 (!%p416_p9), %s2032_s29, 4  ;;  %vm534_vm0 = vcmask (!%p416_p9), 130048   ;;  %s2456_s2 = sld [smem:[#allocation17_spill]] (!%p416_p9)  ;;  %v1933_v1 = vmov (!%p416_p9), 0   ;;  %v510_v2 = vld [vmem:[%s2433_s3] sm:$0xff] (!%p416_p9)  ;;  %v512_v3 = vld [vmem:[%s2433_s3 + $0x10] sm:$0xff] (!%p416_p9) }
  0x18   : > { %419 = sbr.rel (%p416_p9) target bundleno = 918 (0x396), region = 60  ;;  %p479_p10 = scmp.lt.s32.totalorder (!%p416_p9), %s2062_s20, 31  ;;  %1769 = vset.pattern.permute.xlu0 (!%p416_p9), %v1933_v1  ;;  %1770 = vset.pattern.permute.xlu1 (!%p416_p9), %v1933_v1  ;;  %v511_v4 = vld [vmem:[%s2433_s3 + $0x8] sm:$0xff] (!%p416_p9)  ;;  %v513_v5 = vld [vmem:[%s2433_s3 + $0x18] sm:$0xff] (!%p416_p9)  ;;  %vm2094_vm1 = vmpackc.low (!%p416_p9), %vm534_vm0, %vm534_vm0  ;;  %vm712_vm2 = vcmask (!%p416_p9), 261120   ;;  %v1934_v62 = vmov (!%p416_p9), 0.0|0.0  }
  0x19   : > { %516 = vperm.xlu0 (!%p416_p9), %1769, %v510_v2   ;;  %526 = vperm.xlu1 (!%p416_p9), %1770, %v512_v3   ;;  %s2457_s0 = sld [smem:[#allocation15_spill]] (!%p416_p9)  ;;  %v688_v7 = vld [vmem:[%s2435_s5] sm:$0xff] (!%p416_p9)  ;;  %v689_v13 = vld [vmem:[%s2435_s5 + $0x8] sm:$0xff] (!%p416_p9)  ;;  %v690_v15 = vld [vmem:[%s2435_s5 + $0x10] sm:$0xff] (!%p416_p9)  ;;  %vm1935_vm3 = vmmov (!%p416_p9), 0   ;;  %v1936_v63 = vmov (!%p416_p9), 0.0  }
  0x1a   : > { %v691_v16 = vld [vmem:[%s2435_s5 + $0x18] sm:$0xff] (!%p416_p9)  ;;  %v895_v19 = vld [vmem:[%s2439_s9] sm:$0xf] (!%p416_p9)  ;;  %v685_v59 = vld [vmem:[%s2434_s4 + $0x8] sm:$0xff] (!%p416_p9)  ;;  %1667 = vmatprep.subr.bf16.mxu1 (!%p416_p9), %v1934_v62  ;;  %1562 = vmatprep.mubr.msk.f32.mxu1 (!%p416_p9), %vm1935_vm3, %v1936_v63  ;;  %s2460_s1 = sld [smem:[#allocation16_spill]] (!%p416_p9)  ;;  %vm1001_vm4 = vcmask (!%p416_p9), 31744  }
  0x1b   : > { %v815_v21 = vld [vmem:[%s2437_s7] sm:$0xf] (!%p416_p9)  ;;  %v686_v60 = vld [vmem:[%s2434_s4 + $0x10] sm:$0xff] (!%p416_p9)  ;;  %v687_v61 = vld [vmem:[%s2434_s4 + $0x18] sm:$0xff] (!%p416_p9)  ;;  %s1160_s14 = sand.u32 (!%p416_p9), 1, %s2032_s29   ;;  %s2273_s16 = sshll.u32 (!%p416_p9), %s2032_s29, 6 }
  0x1c   : > { %v684_v40 = vld [vmem:[%s2434_s4] sm:$0xff] (!%p416_p9)  ;;  %vm2222_vm5 = vmpackc.low (!%p416_p9), %vm1001_vm4, %vm1001_vm4  ;;  %s2282_s17 = scalar_lea.hbm (!%p416_p9), %s2441_s11, %s2273_s16  ;;  %s2287_s29 = scalar_lea.sflag (!%p416_p9), [#allocation5], %s1160_s14 }
  0x1d   : > { %v506_v0 = vld [vmem:[%s2456_s2] sm:$0xff] (!%p416_p9)  ;;  %521 = vperm.xlu0 (!%p416_p9), %1769, %v511_v4   ;;  %531 = vperm.xlu1 (!%p416_p9), %1770, %v513_v5   ;;  %v507_v37 = vld [vmem:[%s2456_s2 + $0x8] sm:$0xff] (!%p416_p9)  ;;  %v508_v38 = vld [vmem:[%s2456_s2 + $0x10] sm:$0xff] (!%p416_p9) }
  0x1e   : > { %1534 = vmatprep.mubr.msk.f32.mxu0 (!%p416_p9), %vm534_vm0, %v506_v0  ;;  %v509_v39 = vld [vmem:[%s2456_s2 + $0x18] sm:$0xff] (!%p416_p9) }
  0x1f   : > { %s2076_s30 = scalar_select %p479_p10, %s2062_s20, 31 }
  0x21   : > { %s1390_s23 = sshll.u32 %s2076_s30, 3  ;;  %694 = vperm.xlu0 %1769, %v688_v7   ;;  %699 = vperm.xlu1 %1770, %v689_v13   ;;  %s2266_s30 = sand.u32 1, %s1923_s26  }
  0x22   : > { %s2090_s15 = scalar_lea.vmem %s2457_s0, %s1390_s23  ;;  %s2209_s27 = scalar_lea.vmem %s2460_s1, %s1390_s23 }
  0x23   : > { %v490_v8 = vld [vmem:[%s2090_s15] sm:$0xff]  ;;  %v491_v9 = vld [vmem:[%s2090_s15 + $0x8] sm:$0xff]  ;;  %v492_v10 = vld [vmem:[%s2090_s15 + $0x10] sm:$0xff]  ;;  %s2269_s23 = sshll.u32 %s2266_s30, 2  ;;  %s1937_s0 = smov [#allocation4]  }
  0x24   : > { %v1611_v11 = vpack.c.bf16 %v491_v9, %v490_v8  ;;  %v493_v12 = vld [vmem:[%s2090_s15 + $0x18] sm:$0xff]  ;;  %v494_v17 = vld [vmem:[%s2090_s15 + $0x20] sm:$0xff]  ;;  %v495_v18 = vld [vmem:[%s2090_s15 + $0x28] sm:$0xff]  ;;  %s464_s21 = scalar_lea.vmem [#allocation4], %s2269_s23  ;;  %s1781_s1 = sshll.u32 %s1937_s0, 4  ;;  %s1782_s1 = int_to_ptr.vmem [resolvable:$false] %s1781_s1 }
  0x25   : > { %v1617_v14 = vpack.c.bf16 %v493_v12, %v492_v10  ;;  %704 = vperm.xlu0 %1769, %v690_v15   ;;  %709 = vperm.xlu1 %1770, %v691_v16   ;;  %v1623_v20 = vpack.c.bf16 %v495_v18, %v494_v17  ;;  %v496_v22 = vld [vmem:[%s2090_s15 + $0x30] sm:$0xff]  ;;  %v497_v23 = vld [vmem:[%s2090_s15 + $0x38] sm:$0xff]  ;;  %v498_v25 = vld [vmem:[%s2090_s15 + $0x40] sm:$0xff]  ;;  %s1196_s22 = sshll.u32 %s464_s21, 4  ;;  %s1783_s24 = scalar_lea.vmem %s1782_s1, 128  ;;  %s2284_s22 = int_to_ptr.vmem [resolvable:$true] %s1196_s22 }
  0x26   : > { %1613 = vmatprep.subr.msk.bf16.mxu0 %vm2094_vm1, %v1611_v11  ;;  %v1629_v24 = vpack.c.bf16 %v497_v23, %v496_v22  ;;  %v499_v26 = vld [vmem:[%s2090_s15 + $0x48] sm:$0xff]  ;;  %v500_v28 = vld [vmem:[%s2090_s15 + $0x50] sm:$0xff]  ;;  %v501_v29 = vld [vmem:[%s2090_s15 + $0x58] sm:$0xff]  ;;  %p1784_p0 = scmp.lt.s32.totalorder %s2284_s22, %s1782_s1 }
  0x27   : > { %1616 = vmatpush3.bf16.xpose.msk.msra.mxu0 %vm2094_vm1, %v1611_v11  ;;  %v1635_v27 = vpack.c.bf16 %v499_v26, %v498_v25  ;;  %v1641_v30 = vpack.c.bf16 %v501_v29, %v500_v28  ;;  %v502_v31 = vld [vmem:[%s2090_s15 + $0x60] sm:$0xff]  ;;  %v503_v32 = vld [vmem:[%s2090_s15 + $0x68] sm:$0xff]  ;;  %v504_v34 = vld [vmem:[%s2090_s15 + $0x70] sm:$0xff] }
  0x28   : > { %1619 = vmatprep.subr.msk.bf16.mxu0 %vm2094_vm1, %v1617_v14  ;;  %v1647_v33 = vpack.c.bf16 %v503_v32, %v502_v31  ;;  %v505_v35 = vld [vmem:[%s2090_s15 + $0x78] sm:$0xff]  ;;  %v814_v18 = vld [vmem:[%s2436_s6] sm:$0xf]  ;;  %v990_v28 = vld [vmem:[%s2209_s27 + $0x28] sm:$0xff]  ;;  %s1777_s15 = scalar_lea.vmem %s2284_s22, 64 }
  0x29   : > { %898 = vperm.xlu0 %1769, %v895_v19   ;;  %818 = vperm.xlu1 %1770, %v815_v21   ;;  %v1653_v36 = vpack.c.bf16 %v505_v35, %v504_v34  ;;  %v894_v19 = vld [vmem:[%s2438_s8] sm:$0xf]  ;;  %v986_v21 = vld [vmem:[%s2209_s27 + $0x8] sm:$0xff]  ;;  %v988_v25 = vld [vmem:[%s2209_s27 + $0x18] sm:$0xff]  ;;  %p1778_p11 = scmp.ne.s32.totalorder %s2284_s22, %s1777_s15  ;;  %p1785_p1 = scmp.lt.s32.totalorder %s1783_s24, %s1777_s15 }
  0x2a   : > { %v992_v31 = vld [vmem:[%s2209_s27 + $0x38] sm:$0xff]  ;;  %v994_v34 = vld [vmem:[%s2209_s27 + $0x48] sm:$0xff] }
  0x2b   : > { %p1779_p12 = pnand %p1778_p11, %p2051_p5  ;;  %p1786_p2 = por %p1785_p1, %p1784_p0 }
  0x2d   : > { %p1780_p13 = pneg %p1779_p12 }
  0x2f   : > { %1622 = vmatpush3.bf16.xpose.msk.msra.mxu0 %vm2094_vm1, %v1617_v14  ;;  %p1787_p3 = pnand %p1786_p2, %p1780_p13 }
  0x30   : > { %1625 = vmatprep.subr.msk.bf16.mxu0 %vm2094_vm1, %v1623_v20 }
  0x37   : > { %1628 = vmatpush3.bf16.xpose.msk.msra.mxu0 %vm2094_vm1, %v1623_v20  ;;  %v985_v20 = vld [vmem:[%s2209_s27] sm:$0xff] }
  0x38   : > { %1631 = vmatprep.subr.msk.bf16.mxu0 %vm2094_vm1, %v1629_v24  ;;  %v1680_v22 = vpack.c.bf16 %v986_v21, %v985_v20 }
  0x3f   : > { %1634 = vmatpush3.bf16.xpose.msk.msra.mxu0 %vm2094_vm1, %v1629_v24  ;;  %v987_v24 = vld [vmem:[%s2209_s27 + $0x10] sm:$0xff] }
  0x40   : > { %1637 = vmatprep.subr.msk.bf16.mxu0 %vm2094_vm1, %v1635_v27  ;;  %v1684_v26 = vpack.c.bf16 %v988_v25, %v987_v24 }
  0x47   : > { %1640 = vmatpush3.bf16.xpose.msk.msra.mxu0 %vm2094_vm1, %v1635_v27  ;;  %v989_v27 = vld [vmem:[%s2209_s27 + $0x20] sm:$0xff] }
  0x48   : > { %1643 = vmatprep.subr.msk.bf16.mxu0 %vm2094_vm1, %v1641_v30  ;;  %v1688_v29 = vpack.c.bf16 %v990_v28, %v989_v27 }
  0x4f   : > { %1646 = vmatpush3.bf16.xpose.msk.msra.mxu0 %vm2094_vm1, %v1641_v30  ;;  %v991_v30 = vld [vmem:[%s2209_s27 + $0x30] sm:$0xff] }
  0x50   : > { %1649 = vmatprep.subr.msk.bf16.mxu0 %vm2094_vm1, %v1647_v33  ;;  %v1692_v32 = vpack.c.bf16 %v992_v31, %v991_v30 }
  0x57   : > { %1652 = vmatpush3.bf16.xpose.msk.msra.mxu0 %vm2094_vm1, %v1647_v33  ;;  %v993_v33 = vld [vmem:[%s2209_s27 + $0x40] sm:$0xff] }
  0x58   : > { %1655 = vmatprep.subr.msk.bf16.mxu0 %vm2094_vm1, %v1653_v36  ;;  %v1696_v35 = vpack.c.bf16 %v994_v34, %v993_v33 }
  0x5f   : > { %1658 = vmatpush3.bf16.xpose.msk.msra.mxu0 %vm2094_vm1, %v1653_v36  ;;  %v995_v36 = vld [vmem:[%s2209_s27 + $0x50] sm:$0xff] }
  0x66   : > { %1535 = vmatmul.mubr.msk.f32.vlgmr.msra.gmra.mrb[0].mxu0 %vm534_vm0, %v507_v37  ;;  %v996_v37 = vld [vmem:[%s2209_s27 + $0x58] sm:$0xff] }
  0x67   : > { %1537 = vmatprep.mubr.msk.f32.mxu0 %vm534_vm0, %v508_v38  ;;  %v1700_v38 = vpack.c.bf16 %v996_v37, %v995_v36 }
  0x6a   : > { %1538 = vmatmul.mubr.msk.f32.gmra.mrb[2].mxu0 %vm534_vm0, %v509_v39  ;;  %v997_v39 = vld [vmem:[%s2209_s27 + $0x60] sm:$0xff] }
  0x6b   : > { %1548 = vmatprep.mubr.msk.f32.mxu0 %vm712_vm2, %v684_v40  ;;  %v998_v40 = vld [vmem:[%s2209_s27 + $0x68] sm:$0xff] }
  0x98   : > { %v517_v41 = vpop.permute.xlu0 %516  ;;  %v527_v42 = vpop.permute.xlu1 %526 }
  0x9c   : > { %v522_v43 = vpop.permute.xlu0 %521  ;;  %v532_v49 = vpop.permute.xlu1 %531 }
  0xa0   : > { %v700_v0 = vpop.permute.xlu1 %699  ;;  %v695_v1 = vpop.permute.xlu0 %694 }
  0xa4   : > { %v710_v7 = vpop.permute.xlu1 %709  ;;  %v705_v10 = vpop.permute.xlu0 %704 }
 0x139   : > { %v1536_v44 = vpop.f32.mrb[0].mxu0 }
 0x13a   : > { %v667_v45 = vadd.f32 %v1536_v44, %v522_v43  ;;  %v661_v46 = vpop.f32.mrb[1].mxu0  ;;  %v1000_v43 = vld [vmem:[%s2209_s27 + $0x78] sm:$0xff]  ;;  %v978_v44 = vlaneseq }
 0x13b   : > { %v662_v47 = vadd.f32 %v661_v46, %v517_v41  ;;  %v1704_v41 = vpack.c.bf16 %v998_v40, %v997_v39 }
 0x13c   : > { %v681_v48 = vmax.f32 %v667_v45, 0.0  ;;  %v979_v46 = vshrl.u32 %v978_v44, 7 }
 0x13d   : > { %v680_v50 = vmax.f32 %v662_v47, 0.0  ;;  %v1539_v51 = vpop.f32.mrb[2].mxu0  ;;  %v981_v47 = vand.u32 127, %v978_v44 }
 0x13e   : > { %v677_v52 = vadd.f32 %v1539_v51, %v532_v49  ;;  %v671_v53 = vpop.f32.mrb[3].mxu0  ;;  %v819_v49 = vpop.permute.xlu1 %818 }
 0x13f   : > { %v1659_v54 = vpack.c.bf16 %v681_v48, %v680_v50  ;;  %v672_v55 = vadd.f32 %v671_v53, %v527_v42  ;;  %v999_v42 = vld [vmem:[%s2209_s27 + $0x70] sm:$0xff]  ;;  %vm982_vm6 = vcmp.eq.s32.totalorder %v979_v46, %v981_v47 }
 0x140   : > { %v683_v56 = vmax.f32 %v677_v52, 0.0  ;;  %v1708_v45 = vpack.c.bf16 %v1000_v43, %v999_v42  ;;  %v1419_v48 = vsel %vm982_vm6, 1.0, %v1936_v63 }
 0x141   : > { %v682_v57 = vmax.f32 %v672_v55, 0.0  ;;  %1660 = vmatprep.subr.bf16.mxu0 %v1659_v54 }
 0x142   : > { %1662 = vmatpush3.bf16.msra.mxu0 %v1659_v54 }
 0x143   : > { %v1663_v58 = vpack.c.bf16 %v683_v56, %v682_v57 }
 0x145   : > { %1664 = vmatprep.subr.bf16.mxu0 %v1663_v58 }
 0x146   : > { %1666 = vmatpush3.bf16.msra.mxu0 %v1663_v58 }
 0x149   : > { %1549 = vmatmul.mubr.msk.f32.vlgmr.msra.gmra.mrb[4].mxu0 %vm712_vm2, %v685_v59 }
 0x14a   : > { %1551 = vmatprep.mubr.msk.f32.mxu0 %vm712_vm2, %v686_v60 }
 0x14d   : > { %1552 = vmatmul.mubr.msk.f32.gmra.mrb[6].mxu0 %vm712_vm2, %v687_v61 }
 0x21c   : > { %v1550_v2 = vpop.f32.mrb[4].mxu0 }
 0x21d   : > { %v797_v3 = vadd.f32 %v1550_v2, %v700_v0  ;;  %v791_v4 = vpop.f32.mrb[5].mxu0 }
 0x21e   : > { %v792_v5 = vadd.f32 %v791_v4, %v695_v1 }
 0x21f   : > { %v811_v6 = vmax.f32 %v797_v3, 0.0 }
 0x220   : > { %v810_v8 = vmax.f32 %v792_v5, 0.0  ;;  %v1553_v9 = vpop.f32.mrb[6].mxu0 }
 0x221   : > { %v807_v11 = vadd.f32 %v1553_v9, %v710_v7  ;;  %v801_v12 = vpop.f32.mrb[7].mxu0 }
 0x222   : > { %v802_v13 = vadd.f32 %v801_v12, %v705_v10  ;;  %v1668_v14 = vpack.c.bf16 %v811_v6, %v810_v8 }
 0x223   : > { %v813_v15 = vmax.f32 %v807_v11, 0.0 }
 0x224   : > { %v812_v16 = vmax.f32 %v802_v13, 0.0  ;;  %1669 = vmatpush3.bf16.msra.mxu1 %v1668_v14 }
 0x225   : > { %1670 = vmatprep.subr.bf16.mxu1 %v1934_v62 }
 0x226   : > { %v1671_v17 = vpack.c.bf16 %v813_v15, %v812_v16 }
 0x228   : > { %1672 = vmatpush3.bf16.msra.mxu1 %v1671_v17 }
 0x229   : > { %1673 = vmatprep.subr.bf16.mxu1 %v1934_v62 }
 0x22b   : > { %1563 = vmatmul.mubr.msk.f32.vlgmr.msra.gmra.mrb[0].mxu1 %vm712_vm2, %v814_v18 }
 0x22c   : > { %1675 = vmatpush3.bf16.msra.mxu1 %v1668_v14  ;;  %1573 = vmatprep.mubr.msk.f32.mxu1 %vm1935_vm3, %v1936_v63 }
 0x22d   : > { %1676 = vmatprep.subr.bf16.mxu1 %v1934_v62 }
 0x230   : > { %1678 = vmatpush3.bf16.msra.mxu1 %v1671_v17 }
 0x231   : > { %1679 = vmatprep.subr.bf16.mxu1 %v1934_v62 }
 0x233   : > { %1574 = vmatmul.mubr.msk.f32.vlgmr.msra.gmra.mrb[2].mxu1 %vm712_vm2, %v894_v19 }
 0x234   : > { %1608 = vmatprep.mubr.msk.f32.mxu1 %vm1935_vm3, %v1936_v63 }
 0x239   : > { %1682 = vmatpush3.bf16.xpose.msk.msra.mxu1 %vm2222_vm5, %v1680_v22 }
 0x23a   : > { %1683 = vmatprep.subr.bf16.mxu1 %v1934_v62 }
 0x241   : > { %1686 = vmatpush3.bf16.xpose.msk.msra.mxu1 %vm2222_vm5, %v1684_v26 }
 0x242   : > { %1687 = vmatprep.subr.bf16.mxu1 %v1934_v62 }
 0x249   : > { %1690 = vmatpush3.bf16.xpose.msk.msra.mxu1 %vm2222_vm5, %v1688_v29 }
 0x24a   : > { %1691 = vmatprep.subr.bf16.mxu1 %v1934_v62 }
 0x251   : > { %1694 = vmatpush3.bf16.xpose.msk.msra.mxu1 %vm2222_vm5, %v1692_v32 }
 0x252   : > { %1695 = vmatprep.subr.bf16.mxu1 %v1934_v62 }
 0x259   : > { %1698 = vmatpush3.bf16.xpose.msk.msra.mxu1 %vm2222_vm5, %v1696_v35 }
 0x25a   : > { %1699 = vmatprep.subr.bf16.mxu1 %v1934_v62 }
 0x261   : > { %1702 = vmatpush3.bf16.xpose.msk.msra.mxu1 %vm2222_vm5, %v1700_v38 }
 0x262   : > { %1703 = vmatprep.subr.bf16.mxu1 %v1934_v62 }
 0x269   : > { %1706 = vmatpush3.bf16.xpose.msk.msra.mxu1 %vm2222_vm5, %v1704_v41 }
 0x26a   : > { %1707 = vmatprep.subr.bf16.mxu1 %v1934_v62 }
 0x271   : > { %1710 = vmatpush3.bf16.xpose.msk.msra.mxu1 %vm2222_vm5, %v1708_v45 }
 0x278   : > { %1609 = vmatmul.mubr.msk.f32.vlgmr.msra.gmra.mrb[4].mxu1 %vm1001_vm4, %v1419_v48 }
 0x2fe   : > { %v890_v50 = vpop.f32.mrb[0].mxu1 }
 0x2ff   : > { %v2276_v51 = vadd.f32 %v890_v50, %v819_v49  ;;  %v1564_v52 = vpop.f32.mrb[1].mxu1 }
 0x301   : > { %1152 = vst [vmem:[%s464_s21] sm:$0xf] %v2276_v51 }
 0x302   : > { %1790 = shalt.err (!%p1787_p3)
}
 0x303   : > { %s1791_s14 = scalar_lea.hbm %s2282_s17, 64  ;;  %s1795_s0 = scalar_lea.hbm %s2441_s11, 128 }
 0x304   : > { %p1792_p4 = scmp.ne.s32.totalorder %s2282_s17, %s1791_s14  ;;  %p1796_p9 = scmp.lt.u32.totalorder %s2282_s17, %s2441_s11 }
 0x305   : > { %p1797_p10 = scmp.lt.u32.totalorder %s1795_s0, %s1791_s14  ;;  %p1799_p12 = scmp.lt.u32.totalorder %s1791_s14, %s2282_s17 }
 0x306   : > { %p1793_p7 = pnand %p1792_p4, %p2051_p5 }
 0x307   : > { %p1798_p11 = por %p1797_p10, %p1796_p9 }
 0x308   : > { %p1794_p8 = pneg %p1793_p7 }
 0x309   : > { %p1800_p13 = por %p1799_p12, %p1798_p11 }
 0x30b   : > { %p1801_p0 = pnand %p1800_p13, %p1794_p8 }
 0x30d   : > { %1804 = shalt.err (!%p1801_p0)
}
 0x30e   : > { %1712 = dma.vmem_to_hbm [thread:$0]  (%p2051_p5), %s2284_s22, 64, %s2282_s17, %s2287_s29   ;;  %v899_v53 = vpop.permute.xlu0 %898  ;;  %v970_v54 = vpop.f32.mrb[2].mxu1 }
 0x30f   : > { %v971_v55 = vadd.f32 %v970_v54, %v899_v53  ;;  %v1575_v56 = vpop.f32.mrb[3].mxu1  ;;  %s471_s2 = scalar_lea.vmem [#allocation6], %s2269_s23  ;;  %s2319_s21 = scalar_lea.hbm %s2442_s12, %s2273_s16 }
 0x310   : > { %s1209_s15 = sshll.u32 %s471_s2, 4  ;;  %s1938_s17 = smov [#allocation6]   ;;  %s2321_s15 = int_to_ptr.vmem [resolvable:$true] %s1209_s15 }
 0x311   : > { %v974_v57 = vmax.f32 %v971_v55, -20.0  ;;  %s1805_s22 = scalar_lea.vmem %s2321_s15, 64  ;;  %s1809_s27 = sshll.u32 %s1938_s17, 4  ;;  %s1810_s27 = int_to_ptr.vmem [resolvable:$false] %s1809_s27 }
 0x312   : > { %p1806_p1 = scmp.ne.s32.totalorder %s2321_s15, %s1805_s22  ;;  %s1811_s0 = scalar_lea.vmem %s1810_s27, 128 }
 0x313   : > { %v2311_v58 = vmin.f32 %v974_v57, 2.0  ;;  %p1812_p4 = scmp.lt.s32.totalorder %s2321_s15, %s1810_s27  ;;  %p1813_p7 = scmp.lt.s32.totalorder %s1811_s0, %s1805_s22 }
 0x314   : > { %p1807_p2 = pnand %p1806_p1, %p2051_p5 }
 0x315   : > { %v976_v59 = vmul.f32 1.442695, %v2311_v58  ;;  %p1814_p8 = por %p1813_p7, %p1812_p4 }
 0x316   : > { %p1808_p3 = pneg %p1807_p2 }
 0x317   : > { %1771 = vpow2.f32 %v976_v59 }
 0x318   : > { %p1815_p9 = pnand %p1814_p8, %p1808_p3 }
 0x321   : > { %v1772_v60 = vpop.eup %1771 }
 0x322   : > { %1153 = vst [vmem:[%s471_s2] sm:$0xf] %v1772_v60 }
 0x323   : > { %1818 = shalt.err (!%p1815_p9)
}
 0x324   : > { %s1819_s1 = scalar_lea.hbm %s2319_s21, 64  ;;  %s1823_s14 = scalar_lea.hbm %s2442_s12, 128 }
 0x325   : > { %p1820_p10 = scmp.ne.s32.totalorder %s2319_s21, %s1819_s1  ;;  %p1824_p13 = scmp.lt.u32.totalorder %s2319_s21, %s2442_s12 }
 0x326   : > { %p1825_p0 = scmp.lt.u32.totalorder %s1823_s14, %s1819_s1  ;;  %p1827_p2 = scmp.lt.u32.totalorder %s1819_s1, %s2319_s21 }
 0x327   : > { %p1821_p11 = pnand %p1820_p10, %p2051_p5 }
 0x328   : > { %p1826_p1 = por %p1825_p0, %p1824_p13 }
 0x329   : > { %p1822_p12 = pneg %p1821_p11 }
 0x32a   : > { %p1828_p3 = por %p1827_p2, %p1826_p1 }
 0x32c   : > { %p1829_p4 = pnand %p1828_p3, %p1822_p12 }
 0x32e   : > { %1832 = shalt.err (!%p1829_p4)
}
 0x32f   : > { %1713 = dma.vmem_to_hbm [thread:$0]  (%p2051_p5), %s2321_s15, 64, %s2319_s21, %s2287_s29   ;;  %vm1128_vm7 = vcmask 1043456  }
 0x330   : > { %s457_s22 = scalar_lea.vmem [#allocation2], %s2269_s23  ;;  %s2351_s24 = scalar_lea.hbm %s2440_s10, %s2273_s16 }
 0x331   : > { %s1183_s0 = sshll.u32 %s457_s22, 4  ;;  %s1156_s29 = scalar_lea.sflag [#allocation3], %s2266_s30  ;;  %s2353_s0 = int_to_ptr.vmem [resolvable:$true] %s1183_s0 }
 0x332   : > { %s1833_s15 = scalar_lea.vmem %s2353_s0, 64  ;;  %s1939_s23 = smov [#allocation2]  }
 0x333   : > { %p1834_p7 = scmp.ne.s32.totalorder %s2353_s0, %s1833_s15  ;;  %s1837_s16 = sshll.u32 %s1939_s23, 4  ;;  %s1838_s16 = int_to_ptr.vmem [resolvable:$false] %s1837_s16 }
 0x334   : > { %s1839_s21 = scalar_lea.vmem %s1838_s16, 128  ;;  %p1840_p10 = scmp.lt.s32.totalorder %s2353_s0, %s1838_s16 }
 0x335   : > { %p1835_p8 = pnand %p1834_p7, %p2051_p5  ;;  %p1841_p11 = scmp.lt.s32.totalorder %s1839_s21, %s1833_s15 }
 0x337   : > { %p1836_p9 = pneg %p1835_p8  ;;  %p1842_p12 = por %p1841_p11, %p1840_p10 }
 0x339   : > { %p1843_p13 = pnand %p1842_p12, %p1836_p9 }
 0x34b   : > { %v1119_v61 = vpop.f32.mrb[4].mxu1 }
 0x34c   : > { %v1123_v62 = vmul.f32 %v1772_v60, %v1119_v61  ;;  %v1610_v63 = vpop.f32.mrb[5].mxu1  ;;  %v1125_v1 = vmul.f32 -0.5, %v1119_v61 }
 0x34e   : > { %v1124_v0 = vadd.f32 %v1123_v62, %v2276_v51  ;;  %v1126_v2 = vmul.f32 %v1125_v1, %v1119_v61 }
 0x350   : > { %1773 = vtanh.f32 %v1124_v0  ;;  %v1127_v4 = vsub.f32 %v1126_v2, %v2311_v58 }
 0x35a   : > { %v1774_v3 = vpop.eup %1773 }
 0x35b   : > { %v1138_v5 = vmul.f32 %v1774_v3, %v1774_v3  ;;  %1151 = vst [vmem:[%s457_s22] sm:$0xf] %v1774_v3 }
 0x35c   : > { %1846 = shalt.err (!%p1843_p13)
}
 0x35d   : > { %s1847_s14 = scalar_lea.hbm %s2351_s24, 64  ;;  %s1851_s22 = scalar_lea.hbm %s2440_s10, 128 }
 0x35e   : > { %p1848_p0 = scmp.ne.s32.totalorder %s2351_s24, %s1847_s14  ;;  %p1852_p3 = scmp.lt.u32.totalorder %s2351_s24, %s2440_s10 }
 0x35f   : > { %p1853_p4 = scmp.lt.u32.totalorder %s1851_s22, %s1847_s14  ;;  %p1855_p8 = scmp.lt.u32.totalorder %s1847_s14, %s2351_s24 }
 0x360   : > { %p1849_p1 = pnand %p1848_p0, %p2051_p5 }
 0x361   : > { %p1854_p7 = por %p1853_p4, %p1852_p3 }
 0x362   : > { %p1850_p2 = pneg %p1849_p1 }
 0x363   : > { %p1856_p9 = por %p1855_p8, %p1854_p7 }
 0x365   : > { %p1857_p10 = pnand %p1856_p9, %p1850_p2 }
 0x367   : > { %1860 = shalt.err (!%p1857_p10)
}
 0x368   : > { %1711 = dma.vmem_to_hbm [thread:$0]  (%p2051_p5), %s2353_s0, 64, %s2351_s24, %s1156_s29   ;;  %v1139_v6 = vsub.f32 1.0, %v1138_v5  ;;  %v1129_v7 = vsel %vm1128_vm7, %v1127_v4, 0.0 }
 0x369   : > { %v1130_v9 = vrot.slane %v1129_v7, 4  ;;  %s477_s0 = scalar_lea.vmem [#allocation7], %s2266_s30  ;;  %s2385_s23 = scalar_lea.hbm %s2443_s13, %s2062_s20 }
 0x36a   : > { %v1140_v8 = vadd.f32 1e-06, %v1139_v6  ;;  %s1222_s24 = sshll.u32 %s477_s0, 4  ;;  %s1171_s16 = scalar_lea.sflag [#allocation8], %s2266_s30  ;;  %s2387_s24 = int_to_ptr.vmem [resolvable:$true] %s1222_s24 }
 0x36b   : > { %v1131_v10 = vadd.f32 %v1130_v9, %v1129_v7  ;;  %s1861_s21 = scalar_lea.vmem %s2387_s24, 16  ;;  %s1940_s14 = smov [#allocation7]  }
 0x36c   : > { %1775 = vlog2.f32 %v1140_v8  ;;  %p1862_p11 = scmp.ne.s32.totalorder %s2387_s24, %s1861_s21  ;;  %s1865_s17 = sshll.u32 %s1940_s14, 4  ;;  %s1866_s17 = int_to_ptr.vmem [resolvable:$false] %s1865_s17 }
 0x36d   : > { %v1132_v11 = vrot.slane %v1131_v10, 2  ;;  %s1867_s27 = scalar_lea.vmem %s1866_s17, 32  ;;  %p1868_p0 = scmp.lt.s32.totalorder %s2387_s24, %s1866_s17 }
 0x36e   : > { %p1863_p12 = pnand %p1862_p11, %p2051_p5  ;;  %p1869_p1 = scmp.lt.s32.totalorder %s1867_s27, %s1861_s21 }
 0x36f   : > { %v1133_v14 = vadd.f32 %v1132_v11, %v1131_v10 }
 0x370   : > { %p1864_p13 = pneg %p1863_p12  ;;  %p1870_p2 = por %p1869_p1, %p1868_p0 }
 0x371   : > { %v1134_v18 = vrot.slane %v1133_v14, 1 }
 0x372   : > { %p1871_p3 = pnand %p1870_p2, %p1864_p13 }
 0x373   : > { %v1135_v20 = vadd.f32 %v1134_v18, %v1133_v14 }
 0x375   : > { %v1437_v23 = vadd.f32 -3.675754, %v1135_v20 }
 0x376   : > { %v1776_v12 = vpop.eup %1775 }
 0x377   : > { %v1142_v13 = vmul.f32 0.6931472, %v1776_v12 }
 0x379   : > { %v1143_v15 = vsel %vm1128_vm7, %v1142_v13, 0.0 }
 0x37a   : > { %v1144_v16 = vrot.slane %v1143_v15, 4 }
 0x37c   : > { %v1145_v17 = vadd.f32 %v1144_v16, %v1143_v15 }
 0x37e   : > { %v1146_v19 = vrot.slane %v1145_v17, 2 }
 0x380   : > { %v1147_v21 = vadd.f32 %v1146_v19, %v1145_v17 }
 0x382   : > { %v1148_v22 = vrot.slane %v1147_v21, 1 }
 0x384   : > { %v1149_v24 = vadd.f32 %v1148_v22, %v1147_v21 }
 0x386   : > { %v1150_v25 = vsub.f32 %v1437_v23, %v1149_v24 }
 0x388   : > { %1154 = vst [vmem:[%s477_s0] sm:$0x1] %v1150_v25 }
 0x389   : > { %1874 = shalt.err (!%p1871_p3)
}
 0x38a   : > { %s1875_s20 = scalar_lea.hbm %s2385_s23, 16  ;;  %s1879_s1 = scalar_lea.hbm %s2443_s13, 32 }
 0x38b   : > { %p1876_p4 = scmp.ne.s32.totalorder %s2385_s23, %s1875_s20  ;;  %p1880_p9 = scmp.lt.u32.totalorder %s2385_s23, %s2443_s13 }
 0x38c   : > { %p1881_p10 = scmp.lt.u32.totalorder %s1879_s1, %s1875_s20  ;;  %p1883_p12 = scmp.lt.u32.totalorder %s1875_s20, %s2385_s23 }
 0x38d   : > { %p1877_p7 = pnand %p1876_p4, %p2051_p5 }
 0x38e   : > { %p1882_p11 = por %p1881_p10, %p1880_p9 }
 0x38f   : > { %p1878_p8 = pneg %p1877_p7 }
 0x390   : > { %p1884_p13 = por %p1883_p12, %p1882_p11 }
 0x392   : > { %p1885_p0 = pnand %p1884_p13, %p1878_p8 }
 0x394   : > { %1888 = shalt.err (!%p1885_p0)
}
 0x395   : > { %1714 = dma.vmem_to_hbm [thread:$0]  (%p2051_p5), %s2387_s24, 16, %s2385_s23, %s1171_s16  }
 0x396 PF: > { %p1732_p1 = scmp.ge.s32.totalorder %s1931_s28, 2  ;;  %s1234_s29 = sand.u32 1, %s1919_s25  }
 0x397   : > { %s1235_s15 = scalar_lea.sflag [#allocation3], %s1234_s29 }
 0x398   : > { %p1720_p2 = pnand %p1732_p1, %p2055_p6 }
 0x39a   : > { %1906 = dma.done.wait (!%p1720_p2), %s1235_s15, 64  }
 0x39b   : > { %1908 = vsyncadd (!%p1720_p2), %s1235_s15, 4294967232  ;;  %s2463_s21 = sadd.s32 4294967294, %s1931_s28  }
 0x39c   : > { %s1243_s14 = sand.u32 1, %s2463_s21  }
 0x39d   : > { %s1244_s17 = scalar_lea.sflag [#allocation5], %s1243_s14 }
 0x39e   : > { %1910 = dma.done.wait (!%p1720_p2), %s1244_s17, 128  }
 0x39f   : > { %1912 = vsyncadd (!%p1720_p2), %s1244_s17, 4294967168  ;;  %s1262_s18 = scalar_lea.sflag [#allocation8], %s1234_s29 }
 0x3a0   : > { %1914 = dma.done.wait (!%p1720_p2), %s1262_s18, 16  }
 0x3a1   : > { %1916 = vsyncadd (!%p1720_p2), %s1262_s18, 4294967280  ;;  %s2464_s28 = sld [smem:[#allocation13_spill]]  ;;  %s2465_s24 = sld [smem:[#allocation12_spill]] }
 0x3a2   : > { %s2466_s27 = sld [smem:[#allocation14_spill]]  ;;  %s2467_s25 = smov %s1923_s26 }
 0x3a7   : > { %p30_p5 = scmp.ge.s32.totalorder %s2464_s28, 4   ;;  %s2468_s26 = smov %s2465_s24 }
 0x3a9   :  { %32 = sbr.rel (!%p30_p5) target bundleno = 11 (0xb), region = 147 }
 0x3b0   :  { %1266 = vsyncpa [#allocation3], 1 }
 0x3b1   :  { %1268 = vsyncpa [#allocation3 + $0x1], 1 }
 0x3b2   :  { %1269 = vsyncpa [#allocation5], 1 }
 0x3b3   :  { %1271 = vsyncpa [#allocation5 + $0x1], 1 }
 0x3b4   :  { %1272 = vsyncpa [#allocation8], 1 }
 0x3b5   :  { %1274 = vsyncpa [#allocation8 + $0x1], 1 }

</bundles_post_ra>
